<compile_context>
chip_gen: v7x
topology: tpu7x:2x2x1
jax: 0.10.0
libtpu: 0.0.40
codegen_flags: <defaults>
</compile_context>

<pallas_src>
import jax
import jax.numpy as jnp
from jax.experimental import pallas as pl
from jax.experimental.pallas import tpu as pltpu


def _normalize_kernel(scale_ref, offset_ref, x_ref, o_ref):
    # scale_ref / offset_ref: (R_BLK, 1) float32 VMEM tiles (row-resident).
    # x_ref / o_ref:          (R_BLK, HW_BLK) VMEM tiles (sublane+lane dense).
    x = x_ref[...].astype(jnp.float32)
    o_ref[...] = ((x - offset_ref[...]) * scale_ref[...]).astype(o_ref.dtype)


def _round_down(v, m):
    return (v // m) * m


def _row_multiple(dtype):
    # Sub-32-bit dtypes pack along sublanes: 8 rows f32, 16 bf16, 32 int8/fp8.
    return max(8, 32 // jnp.dtype(dtype).itemsize)


def _default_tile_bytes():
    # v7x: 3.2 TB/s HBM makes the ~0.35us fixed per-step cost a bigger tax,
    # so use ~8 MiB tiles there; 4 MiB already sits at the roofline knee on
    # v5e/v6e.
    try:
        kind = jax.devices()[0].device_kind.lower()
    except Exception:
        kind = ""
    if "v7" in kind:
        return 8 * 1024 * 1024
    return 4 * 1024 * 1024


def _pick_blocks(nc, hw, itemsize, row_mult, target_bytes):
    """Pick a sublane-/lane-dense (r_blk, hw_blk) tile under target_bytes."""
    min_rows = nc if nc < row_mult else row_mult

    # Lane (last) dim: keep full HW when it fits next to the minimum row
    # block, otherwise block at a multiple of 128 (cdiv grid pads the tail).
    max_hw = max(128, target_bytes // max(1, min_rows * itemsize))
    if hw <= max_hw or hw <= 128:
        hw_blk = hw
    else:
        hw_blk = max(128, min(_round_down(max_hw, 128), _round_down(hw, 128)))

    # Row (sublane) dim: full rows when nc is small, else a multiple of
    # row_mult that keeps the tile under target_bytes.
    if nc <= row_mult:
        r_blk = nc
    else:
        max_rows = max(row_mult, target_bytes // max(1, hw_blk * itemsize))
        r_blk = max(row_mult,
                    min(_round_down(max_rows, row_mult),
                        _round_down(nc, row_mult)))
        # If everything fits in a single block, split rows so v7x's two
        # TensorCores both get work (parallel grid axis).
        if hw_blk >= hw and r_blk >= nc and nc >= 2 * row_mult:
            r_blk = max(row_mult, _round_down(pl.cdiv(nc, 2), row_mult))

    return r_blk, hw_blk


def normalize_variable(x, scale, offset, *, out_dtype=None,
                       target_tile_bytes=None):
    """(x - offset) * scale with per-channel scale/offset, NCHW layout."""
    N, C, H, W = x.shape
    HW = H * W
    NC = N * C
    out_dtype = jnp.dtype(x.dtype) if out_dtype is None else jnp.dtype(out_dtype)
    if target_tile_bytes is None:
        target_tile_bytes = _default_tile_bytes()

    # Per-channel f32 params (matching the PyTorch module's f32 registered
    # buffers), expanded to per-row (N*C, 1) for the flattened 2D layout.
    scale_c = jnp.broadcast_to(jnp.asarray(scale, jnp.float32).reshape(-1), (C,))
    offset_c = jnp.broadcast_to(jnp.asarray(offset, jnp.float32).reshape(-1), (C,))
    scale_rows = jnp.tile(scale_c, N).reshape(NC, 1)
    offset_rows = jnp.tile(offset_c, N).reshape(NC, 1)

    # Free, contiguous reshape: sublane axis = N*C, lane axis = H*W.
    x2 = x.reshape(NC, HW)

    itemsize = max(x.dtype.itemsize, out_dtype.itemsize)
    row_mult = max(_row_multiple(x.dtype), _row_multiple(out_dtype))
    r_blk, hw_blk = _pick_blocks(NC, HW, itemsize, row_mult, target_tile_bytes)

    grid = (pl.cdiv(NC, r_blk), pl.cdiv(HW, hw_blk))

    # VMEM budget: in + out tiles, double-buffered, plus tiny param tiles and
    # some headroom.  Stays well under v7x's 64 MiB physical VMEM.
    in_tile_bytes = r_blk * hw_blk * x.dtype.itemsize
    out_tile_bytes = r_blk * hw_blk * out_dtype.itemsize
    param_bytes = 2 * r_blk * 4
    vmem_limit = 2 * (in_tile_bytes + out_tile_bytes + param_bytes) + (4 << 20)
    vmem_limit = int(min(max(vmem_limit, 16 << 20), 48 << 20))

    cost = pl.CostEstimate(
        flops=2 * x.size,
        transcendentals=0,
        bytes_accessed=(x.size * x.dtype.itemsize
                        + x.size * out_dtype.itemsize
                        + 2 * NC * 4),
    )

    y2 = pl.pallas_call(
        _normalize_kernel,
        out_shape=jax.ShapeDtypeStruct((NC, HW), out_dtype),
        grid_spec=pl.GridSpec(
            grid=grid,
            in_specs=[
                # Params: block index constant across the inner hw axis, so
                # they stay resident instead of being re-DMA'd every step.
                pl.BlockSpec((r_blk, 1), lambda r, h: (r, 0)),    # scale
                pl.BlockSpec((r_blk, 1), lambda r, h: (r, 0)),    # offset
                pl.BlockSpec((r_blk, hw_blk), lambda r, h: (r, h)),  # x
            ],
            out_specs=pl.BlockSpec((r_blk, hw_blk), lambda r, h: (r, h)),
        ),
        compiler_params=pltpu.CompilerParams(
            dimension_semantics=("parallel", "parallel"),
            vmem_limit_bytes=vmem_limit,
        ),
        cost_estimate=cost,
    )(scale_rows, offset_rows, x2)

    return y2.reshape(N, C, H, W)


if __name__ == "__main__":
    key = jax.random.PRNGKey(0)
    N, C, H, W = 2, 4, 16, 16

    # Deterministic "buffer" initialization (synthetic, no checkpoint load).
    x = jax.random.normal(key, (N, C, H, W), dtype=jnp.float32)
    scale = jnp.array([0.5, 1.0, 2.0, 0.25], dtype=jnp.float32)
    offset = jnp.array([0.1, -0.2, 0.3, 0.0], dtype=jnp.float32)

    y = jax.block_until_ready(normalize_variable(x, scale, offset))

    # Reference check (plain JAX broadcast, same as PyTorch semantics).
    y_ref = (x - offset[None, :, None, None]) * scale[None, :, None, None]
    assert y.shape == x.shape and y.dtype == x.dtype
    assert jnp.allclose(y, y_ref, atol=1e-6, rtol=1e-6), "mismatch vs reference"

    print("KERNEL_OK")
</pallas_src>

<mosaic_0001>
module attributes {stable_mosaic.version = 11 : i64} {
  func.func @_normalize_kernel(%arg0: i32, %arg1: i32, %arg2: memref<8x1xf32, #tpu.memory_space<vmem>>, %arg3: memref<8x1xf32, #tpu.memory_space<vmem>>, %arg4: memref<8x256xf32, #tpu.memory_space<vmem>>, %arg5: memref<8x256xf32, #tpu.memory_space<vmem>>) attributes {dimension_semantics = [#tpu.dimension_semantics<parallel>, #tpu.dimension_semantics<parallel>], iteration_bounds = array<i64: 1, 1>, scalar_prefetch = 0 : i64, scratch_operands = 0 : i64, tpu.core_type = #tpu.core_type<tc>, window_params = [{transform_indices = @transform_0, window_bounds = array<i64: 8, 1>}, {transform_indices = @transform_1, window_bounds = array<i64: 8, 1>}, {transform_indices = @transform_2, window_bounds = array<i64: 8, 256>}, {transform_indices = @transform_3, window_bounds = array<i64: 8, 256>}]} {
    %c0 = arith.constant 0 : index
    %c0_0 = arith.constant 0 : index
    %0 = vector.load %arg4[%c0, %c0_0] : memref<8x256xf32, #tpu.memory_space<vmem>>, vector<8x256xf32>
    %c0_1 = arith.constant 0 : index
    %c0_2 = arith.constant 0 : index
    %1 = vector.load %arg3[%c0_1, %c0_2] : memref<8x1xf32, #tpu.memory_space<vmem>>, vector<8x1xf32>
    %2 = vector.broadcast %1 : vector<8x1xf32> to vector<8x256xf32>
    %3 = arith.subf %0, %2 : vector<8x256xf32>
    %c0_3 = arith.constant 0 : index
    %c0_4 = arith.constant 0 : index
    %4 = vector.load %arg2[%c0_3, %c0_4] : memref<8x1xf32, #tpu.memory_space<vmem>>, vector<8x1xf32>
    %5 = vector.broadcast %4 : vector<8x1xf32> to vector<8x256xf32>
    %6 = arith.mulf %3, %5 : vector<8x256xf32>
    %c0_5 = arith.constant 0 : index
    %c0_6 = arith.constant 0 : index
    %7 = vector.load %arg5[%c0_5, %c0_6] : memref<8x256xf32, #tpu.memory_space<vmem>>, vector<8x256xf32>
    tpu.vector_store %arg5[%c0_5, %c0_6], %6 {strides = array<i32>} : memref<8x256xf32, #tpu.memory_space<vmem>>, vector<8x256xf32>,
    return
  }
  func.func @transform_0(%arg0: i32, %arg1: i32) -> (i32, i32) {
    %c0_i32 = arith.constant 0 : i32
    %c0_i32_0 = arith.constant 0 : i32
    return %arg0, %c0_i32 : i32, i32
  }
  func.func @transform_1(%arg0: i32, %arg1: i32) -> (i32, i32) {
    %c0_i32 = arith.constant 0 : i32
    %c0_i32_0 = arith.constant 0 : i32
    return %arg0, %c0_i32 : i32, i32
  }
  func.func @transform_2(%arg0: i32, %arg1: i32) -> (i32, i32) {
    %c0_i32 = arith.constant 0 : i32
    return %arg0, %arg1 : i32, i32
  }
  func.func @transform_3(%arg0: i32, %arg1: i32) -> (i32, i32) {
    %c0_i32 = arith.constant 0 : i32
    return %arg0, %arg1 : i32, i32
  }
}

</mosaic_0001>

<bundles_post_ra>
// kernel: tpu_custom_call.1
= control target key start
LH: loop header
LB: loop body
LE: loop exit
PB: predicated region body
PF: predicated region fallthrough
CT: control target
= control target key end

     0   :  { %s122_s0 = inlined_call_operand.vmem [shape: f32[8,1], index: 0, kind: input, shape index: {}]   ;;  %s123_s1 = inlined_call_operand.vmem [shape: f32[8,1], index: 1, kind: input, shape index: {}]   ;;  %s124_s2 = inlined_call_operand.vmem [shape: f32[8,256], index: 2, kind: input, shape index: {}]   ;;  %s125_s3 = inlined_call_operand.hbm [shape: f32[8,256], index: 3, kind: output, shape index: {}]  }
   0x1   :  { %v17_v0 = vld [vmem:[%s123_s1] sm:$0xff] }
   0x2   :  { %8 = vsyncpa [#allocation3], 0  ;;  %v76_v1 = vmov 0   ;;  %v25_v2 = vld [vmem:[%s122_s0] sm:$0xff]  ;;  %v16_v5 = vld [vmem:[%s124_s2 + $0x8] sm:$0xff]  ;;  %s77_s20 = smov [#allocation2]  }
   0x3   :  { %51 = vset.pattern.permute.xlu0 %v76_v1  ;;  %v15_v4 = vld [vmem:[%s124_s2] sm:$0xff]  ;;  %s41_s1 = sshll.u32 %s77_s20, 4  ;;  %s42_s1 = int_to_ptr.vmem [resolvable:$true] %s41_s1 }
   0x4   :  { %20 = vperm.xlu0 %51, %v17_v0   ;;  %s52_s0 = scalar_lea.vmem %s42_s1, 256  ;;  %p57_p1 = scmp.lt.s32.totalorder %s42_s1, %s42_s1 }
   0x5   :  { %p53_p0 = scmp.ne.s32.totalorder %s42_s1, %s52_s0  ;;  %p58_p2 = scmp.lt.s32.totalorder %s52_s0, %s52_s0 }
   0x7   :  { %p59_p3 = por %p58_p2, %p57_p1 }
   0x8   :  { %28 = vperm.xlu0 %51, %v25_v2  }
   0x9   :  { %p60_p4 = pnand %p59_p3, %p53_p0 }
  0x83   :  { %v21_v3 = vpop.permute.xlu0 %20 }
  0x84   :  { %v23_v6 = vsub.f32 %v15_v4, %v21_v3  ;;  %v24_v7 = vsub.f32 %v16_v5, %v21_v3 }
  0x87   :  { %v29_v8 = vpop.permute.xlu0 %28 }
  0x88   :  { %v31_v9 = vmul.f32 %v29_v8, %v23_v6  ;;  %v32_v10 = vmul.f32 %v29_v8, %v24_v7 }
  0x8a   :  { %33 = vst [vmem:[#allocation2] sm:$0xff] %v31_v9  ;;  %34 = vst [vmem:[#allocation2 + $0x8] sm:$0xff] %v32_v10 }
  0x8b   :  { %63 = shalt.err (!%p60_p4)
}
  0x8c   :  { %s64_s2 = scalar_lea.hbm %s125_s3, 256 }
  0x8d   :  { %p65_p5 = scmp.ne.s32.totalorder %s125_s3, %s64_s2  ;;  %p68_p6 = scmp.lt.u32.totalorder %s64_s2, %s125_s3 }
  0x8f   :  { %p70_p7 = pnand %p68_p6, %p65_p5 }
  0x91   :  { %73 = shalt.err (!%p70_p7)
}
  0x92   :  { %44 = dma.vmem_to_hbm [thread:$0]  %s42_s1, 256, %s125_s3, [#allocation3]  }
  0x93   :  { %74 = dma.done.wait [#allocation3], 256  }
  0x94   :  { %75 = vsyncadd [#allocation3], 4294967040 }
  0x95   :  { %48 = vsyncpa [#allocation3], 1 }

</bundles_post_ra>
